<compile_context>
chip_gen: v6e
topology: v6e:2x2x1
jax: 0.10.0
libtpu: 0.0.40
codegen_flags: <defaults>
</compile_context>

<pallas_src>
import jax
import jax.numpy as jnp
from jax.experimental import pallas as pl
from jax.experimental.pallas import tpu as pltpu

# TODO(synk): the reference module uses an undefined global `p`; fixed to 0.5 here.
P_DROP = 0.5


def _dropout_diff_kernel(x_ref, u_ref, o_ref):
    x = x_ref[...]
    keep = u_ref[...] >= jnp.float32(P_DROP)          # keep with prob (1 - p)
    kept_val = x * jnp.float32(1.0 / (1.0 - P_DROP) - 1.0)   # x*(1/(1-p) - 1)
    o_ref[...] = jnp.where(keep, kept_val, -x)         # dropped: 0 - x = -x


def dropout_diff(x, key):
    """Computes F.dropout(x, P_DROP) - F.dropout(x, 0.0) with a fresh mask per call."""
    orig_shape = x.shape
    # Free metadata reshape to a 2D slab (last dim stays innermost / lane axis).
    x2d = x.reshape(-1, orig_shape[-1])
    # Fresh per-call uniform randoms for the dropout mask.
    u = jax.random.uniform(key, x2d.shape, dtype=jnp.float32)

    out = pl.pallas_call(
        _dropout_diff_kernel,
        out_shape=jax.ShapeDtypeStruct(x2d.shape, x.dtype),
        in_specs=[
            pl.BlockSpec(memory_space=pltpu.MemorySpace.VMEM),  # x slab
            pl.BlockSpec(memory_space=pltpu.MemorySpace.VMEM),  # uniform randoms
        ],
        out_specs=pl.BlockSpec(memory_space=pltpu.MemorySpace.VMEM),
    )(x2d, u)

    return out.reshape(orig_shape)


if __name__ == "__main__":
    key = jax.random.PRNGKey(0)
    kx, kmask = jax.random.split(key)

    # Same shape as the reference script's x1 = torch.randn(1, 2, 3, 5)
    x1 = jax.random.normal(kx, (1, 2, 3, 5), dtype=jnp.float32)

    y = dropout_diff(x1, kmask)
    jax.block_until_ready(y)

    assert y.shape == x1.shape and y.dtype == x1.dtype
    # Sanity: each element is either x*(1/(1-p)-1) (kept) or -x (dropped).
    kept_val = x1 * (1.0 / (1.0 - P_DROP) - 1.0)
    ok = jnp.all(
        jnp.isclose(y, kept_val, atol=1e-6) | jnp.isclose(y, -x1, atol=1e-6)
    )
    assert bool(ok)
    print("KERNEL_OK")
</pallas_src>

<mosaic_0001>
module attributes {stable_mosaic.version = 11 : i64} {
  func.func @_dropout_diff_kernel(%arg0: memref<6x5xf32, #tpu.memory_space<vmem>>, %arg1: memref<6x5xf32, #tpu.memory_space<vmem>>, %arg2: memref<6x5xf32, #tpu.memory_space<vmem>>) attributes {dimension_semantics = [], scalar_prefetch = 0 : i64, scratch_operands = 0 : i64, tpu.core_type = #tpu.core_type<tc>} {
    %c0 = arith.constant 0 : index
    %c0_0 = arith.constant 0 : index
    %0 = vector.load %arg0[%c0, %c0_0] : memref<6x5xf32, #tpu.memory_space<vmem>>, vector<6x5xf32>
    %c0_1 = arith.constant 0 : index
    %c0_2 = arith.constant 0 : index
    %1 = vector.load %arg1[%c0_1, %c0_2] : memref<6x5xf32, #tpu.memory_space<vmem>>, vector<6x5xf32>
    %cst = arith.constant 5.000000e-01 : f32
    %2 = vector.broadcast %cst : f32 to vector<6x5xf32>
    %3 = arith.cmpf oge, %1, %2 : vector<6x5xf32>
    %cst_3 = arith.constant 1.000000e+00 : f32
    %4 = vector.broadcast %cst_3 : f32 to vector<6x5xf32>
    %5 = arith.mulf %0, %4 : vector<6x5xf32>
    %cst_4 = arith.constant 0.000000e+00 : f32
    %6 = vector.broadcast %cst_4 : f32 to vector<6x5xf32>
    %7 = arith.subf %6, %0 : vector<6x5xf32>
    %8 = arith.select %3, %5, %7 : vector<6x5xi1>, vector<6x5xf32>
    %c0_5 = arith.constant 0 : index
    %c0_6 = arith.constant 0 : index
    %9 = vector.load %arg2[%c0_5, %c0_6] : memref<6x5xf32, #tpu.memory_space<vmem>>, vector<6x5xf32>
    tpu.vector_store %arg2[%c0_5, %c0_6], %8 {strides = array<i32>} : memref<6x5xf32, #tpu.memory_space<vmem>>, vector<6x5xf32>,
    return
  }
}

</mosaic_0001>

<bundles_post_ra>
// kernel: tpu_custom_call.1
= control target key start
LH: loop header
LB: loop body
LE: loop exit
PB: predicated region body
PF: predicated region fallthrough
CT: control target
= control target key end

     0   :  { %7 = vsyncpa [#allocation3], 0  ;;  %s155_s0 = inlined_call_operand.hbm [shape: f32[6,5], index: 0, kind: input, shape index: {}]   ;;  %s156_s1 = inlined_call_operand.hbm [shape: f32[6,5], index: 1, kind: input, shape index: {}]   ;;  %s157_s2 = inlined_call_operand.hbm [shape: f32[6,5], index: 2, kind: output, shape index: {}]  }
   0x1   :  { %8 = vsyncpa [#allocation6], 0 }
   0x2   :  { %9 = vsyncpa [#allocation4], 0  ;;  %s128_s9 = smov [#allocation2]   ;;  %s129_s11 = smov [#allocation5]  }
   0x3   :  { %s16_s10 = sshll.u32 %s128_s9, 4  ;;  %s26_s12 = sshll.u32 %s129_s11, 4  ;;  %s17_s10 = int_to_ptr.vmem [resolvable:$true] %s16_s10  ;;  %s27_s12 = int_to_ptr.vmem [resolvable:$true] %s26_s12 }
   0x4   :  { %s70_s13 = scalar_lea.vmem %s17_s10, 128  ;;  %p75_p1 = scmp.lt.s32.totalorder %s17_s10, %s17_s10 }
   0x5   :  { %p71_p0 = scmp.ne.s32.totalorder %s17_s10, %s70_s13  ;;  %p76_p2 = scmp.lt.s32.totalorder %s70_s13, %s70_s13 }
   0x7   :  { %p77_p3 = por %p76_p2, %p75_p1 }
   0x9   :  { %p78_p4 = pnand %p77_p3, %p71_p0 }
   0xb   :  { %81 = shalt.err (!%p78_p4)
}
   0xc   :  { %19 = dma.hbm_to_vmem [thread:$0]  %s155_s0, 128, %s17_s10, [#allocation3]  }
   0xd   :  { %s90_s16 = scalar_lea.vmem %s27_s12, 128  ;;  %p95_p6 = scmp.lt.s32.totalorder %s27_s12, %s27_s12 }
   0xe   :  { %p91_p5 = scmp.ne.s32.totalorder %s27_s12, %s90_s16  ;;  %p96_p7 = scmp.lt.s32.totalorder %s90_s16, %s90_s16 }
  0x10   :  { %p97_p8 = por %p96_p7, %p95_p6 }
  0x12   :  { %p98_p9 = pnand %p97_p8, %p91_p5 }
  0x14   :  { %101 = shalt.err (!%p98_p9)
}
  0x15   :  { %29 = dma.hbm_to_vmem [thread:$0]  %s156_s1, 128, %s27_s12, [#allocation6]  }
  0x16   :  { %122 = dma.done.wait [#allocation3], 128  }
  0x17   :  { %123 = vsyncadd [#allocation3], 4294967168 }
  0x18   :  { %124 = dma.done.wait [#allocation6], 128  }
  0x19   :  { %125 = vsyncadd [#allocation6], 4294967168  ;;  %s130_s19 = smov [#allocation7]   ;;  %v36_v0 = vld [vmem:[#allocation2] sm:$0x3f]  ;;  %vm41_vm1 = vcmask 37888  }
  0x1a   :  { %s49_s20 = sshll.u32 %s130_s19, 4  ;;  %v37_v1 = vld [vmem:[#allocation5] sm:$0x3f]  ;;  %v39_v2 = vsub.f32 0.0, %v36_v0  ;;  %s50_s20 = int_to_ptr.vmem [resolvable:$true] %s49_s20 }
  0x1b   :  { %vm38_vm0 = vcmp.ge.f32.partialorder %v37_v1, 0.5  ;;  %s102_s0 = scalar_lea.vmem %s50_s20, 128  ;;  %p107_p11 = scmp.lt.s32.totalorder %s50_s20, %s50_s20 }
  0x1c   :  { %v40_v3 = vsel %vm38_vm0, %v36_v0, %v39_v2  ;;  %p103_p10 = scmp.ne.s32.totalorder %s50_s20, %s102_s0  ;;  %p108_p12 = scmp.lt.s32.totalorder %s102_s0, %s102_s0 }
  0x1d   :  { %42 = vst.msk [vmem:[#allocation7] sm:$0x3f] %vm41_vm1, %v40_v3 }
  0x1e   :  { %p109_p13 = por %p108_p12, %p107_p11 }
  0x20   :  { %p110_p0 = pnand %p109_p13, %p103_p10 }
  0x22   :  { %113 = shalt.err (!%p110_p0)
}
  0x23   :  { %52 = dma.vmem_to_hbm [thread:$0]  %s50_s20, 128, %s157_s2, [#allocation4]  }
  0x24   :  { %126 = dma.done.wait [#allocation4], 128  }
  0x25   :  { %127 = vsyncadd [#allocation4], 4294967168 }
  0x26   :  { %56 = vsyncpa [#allocation3], 1 }
  0x27   :  { %57 = vsyncpa [#allocation6], 1 }
  0x28   :  { %58 = vsyncpa [#allocation4], 1 }

</bundles_post_ra>
